<compile_context>
chip_gen: v7x
topology: tpu7x:2x2x1
jax: 0.10.0
libtpu: 0.0.40
codegen_flags: <defaults>
</compile_context>

<pallas_src>
import jax
import jax.numpy as jnp
from jax.experimental import pallas as pl
from jax.experimental.pallas import tpu as pltpu

LN_EPS = 1e-5


def _patch_merge_kernel(x_ref, g_ref, b_ref, w_ref, o_ref):
    # x_ref: (tp, 2, W//2, 2C)  tp row-pairs of the image; dim1 = row parity,
    #        last dim = [col 2j channels | col 2j+1 channels].
    # g_ref, b_ref: (1, 4C) LayerNorm affine params.
    # w_ref: (4C, 2C) reduction weight (transpose of the torch Linear weight).
    # o_ref: (tp * W//2, 2C)
    tp, _, w2, c2 = x_ref.shape
    c = c2 // 2
    rows = tp * w2

    even = x_ref[:, 0]   # (tp, W//2, 2C): rows 2i   -> [x(2i,  2j) | x(2i,  2j+1)]
    odd = x_ref[:, 1]    # (tp, W//2, 2C): rows 2i+1 -> [x(2i+1,2j) | x(2i+1,2j+1)]

    # torch channel order: cat([x0,x1,x2,x3]) = [(ev,2j), (od,2j), (ev,2j+1), (od,2j+1)]
    merged = jnp.concatenate(
        [even[..., :c], odd[..., :c], even[..., c:], odd[..., c:]], axis=-1
    ).reshape(rows, 4 * c)

    # LayerNorm over 4C in f32, one pass: sum and sum-of-squares.
    xf = merged.astype(jnp.float32)
    inv_n = 1.0 / (4 * c)
    s1 = jnp.sum(xf, axis=-1, keepdims=True)
    s2 = jnp.sum(xf * xf, axis=-1, keepdims=True)
    mean = s1 * inv_n
    var = jnp.maximum(s2 * inv_n - mean * mean, 0.0)  # torch LN: biased variance
    inv_std = jax.lax.rsqrt(var + LN_EPS)

    g = g_ref[...].astype(jnp.float32)
    b = b_ref[...].astype(jnp.float32)
    y = (xf - mean) * inv_std * g + b

    # 4C -> 2C projection.  Run the MXU in the weight dtype (native bf16 path on
    # v6e/v7x when weights are bf16) while accumulating in f32.
    w = w_ref[...]
    o_ref[...] = jnp.dot(
        y.astype(w.dtype), w, preferred_element_type=jnp.float32
    ).astype(o_ref.dtype)


def _pick_tp(num_row_pairs, w2, target_rows):
    """Number of row-pairs per grid step.

    Must divide num_row_pairs exactly (no tail blocks / no single-block
    collapse for large inputs).  Prefer:
      * output-block sublane dim (tp * w2) a multiple of 8 (layout rule),
      * <= target_rows output rows per block (VMEM / pipelining budget),
      * at least 2 grid steps so the 'parallel' grid can shard across cores.
    """
    divisors = [t for t in range(1, num_row_pairs + 1) if num_row_pairs % t == 0]

    def layout_ok(t):
        return (t * w2) % 8 == 0 or t == num_row_pairs

    cap = max(1, target_rows // max(w2, 1))
    for need_multi_step in (True, False):
        pool = [
            t
            for t in divisors
            if layout_ok(t)
            and t <= cap
            and (num_row_pairs // t >= 2 or not need_multi_step)
        ]
        if pool:
            return max(pool)
    return min(t for t in divisors if layout_ok(t))


def patch_merging(x, gamma, beta, w_red, input_resolution, *, target_rows=1024):
    """x: (B, H*W, C) -> (B, (H//2)*(W//2), 2*C)  (SwinIR PatchMerging forward)."""
    H, W = input_resolution
    B, L, C = x.shape
    assert L == H * W, "input feature has wrong size"
    assert H % 2 == 0 and W % 2 == 0, f"x size ({H}*{W}) are not even."

    w2 = W // 2
    R = B * (H // 2)          # row-pairs
    M = R * w2                # merged tokens
    c_out = w_red.shape[1]    # 2C

    # Free, contiguous reshape: (B, H*W, C) -> (row-pair, row-parity, col-pair, 2C).
    x4 = x.reshape(R, 2, w2, 2 * C)

    # Cap the per-block row count so double-buffered in+out stays well under the
    # scoped-VMEM limit even on v7x (64 MiB physical / 32 MiB scoped per core).
    in_bytes_per_row = 4 * C * jnp.dtype(x.dtype).itemsize
    out_bytes_per_row = c_out * jnp.dtype(x.dtype).itemsize
    vmem_row_cap = max(8, (8 << 20) // (2 * (in_bytes_per_row + out_bytes_per_row)))
    tp = _pick_tp(R, w2, min(target_rows, vmem_row_cap))
    rows_per_block = tp * w2
    grid = (R // tp,)

    out = pl.pallas_call(
        _patch_merge_kernel,
        out_shape=jax.ShapeDtypeStruct((M, c_out), x.dtype),
        grid_spec=pltpu.PrefetchScalarGridSpec(
            num_scalar_prefetch=0,
            grid=grid,
            in_specs=[
                # Streaming input: tp row-pairs per step (contiguous HBM block).
                # If DMA is still exposed at small C, pipeline_mode=pl.Buffered(3)
                # on this spec is the next knob to try.
                pl.BlockSpec((tp, 2, w2, 2 * C), lambda i: (i, 0, 0, 0)),
                # Resident params (constant block index -> stay in VMEM).
                pl.BlockSpec((1, 4 * C), lambda i: (0, 0)),
                pl.BlockSpec((1, 4 * C), lambda i: (0, 0)),
                pl.BlockSpec((4 * C, c_out), lambda i: (0, 0)),
            ],
            out_specs=pl.BlockSpec((rows_per_block, c_out), lambda i: (i, 0)),
        ),
        compiler_params=pltpu.CompilerParams(
            dimension_semantics=("parallel",),
        ),
    )(x4, gamma.reshape(1, 4 * C), beta.reshape(1, 4 * C), w_red)

    return out.reshape(B, (H // 2) * w2, c_out)


def _reference(x, gamma, beta, w_red, input_resolution):
    """Pure-JAX reference mirroring the PyTorch forward."""
    H, W = input_resolution
    B, L, C = x.shape
    xg = x.reshape(B, H, W, C)
    x0 = xg[:, 0::2, 0::2, :]
    x1 = xg[:, 1::2, 0::2, :]
    x2 = xg[:, 0::2, 1::2, :]
    x3 = xg[:, 1::2, 1::2, :]
    xc = jnp.concatenate([x0, x1, x2, x3], axis=-1).reshape(B, -1, 4 * C)
    xc = xc.astype(jnp.float32)
    mean = jnp.mean(xc, axis=-1, keepdims=True)
    var = jnp.mean((xc - mean) ** 2, axis=-1, keepdims=True)
    xn = (xc - mean) / jnp.sqrt(var + LN_EPS)
    y = xn * gamma + beta
    return (y @ w_red).astype(x.dtype)


if __name__ == "__main__":
    # Small shapes consistent with the module: B=2, H=W=16, dim(C)=4.
    B, H, W, C = 2, 16, 16, 4
    key = jax.random.PRNGKey(0)
    kx, kg, kb, kw = jax.random.split(key, 4)

    x = jax.random.normal(kx, (B, H * W, C), dtype=jnp.float32)
    # LayerNorm(4C) affine + Linear(4C -> 2C, no bias) parameters.
    gamma = 1.0 + 0.1 * jax.random.normal(kg, (4 * C,), dtype=jnp.float32)
    beta = 0.1 * jax.random.normal(kb, (4 * C,), dtype=jnp.float32)
    # torch nn.Linear weight has shape (2C, 4C); we store its transpose (4C, 2C).
    w_red = (jax.random.normal(kw, (4 * C, 2 * C), dtype=jnp.float32)
             / jnp.sqrt(4.0 * C))

    out = patch_merging(x, gamma, beta, w_red, (H, W))
    out = jax.block_until_ready(out)

    ref = _reference(x, gamma, beta, w_red, (H, W))
    assert out.shape == (B, (H // 2) * (W // 2), 2 * C), out.shape
    assert jnp.allclose(out, ref, atol=1e-4, rtol=1e-4), "mismatch vs reference"

    print("KERNEL_OK")
</pallas_src>

<mosaic_0001>
module attributes {stable_mosaic.version = 11 : i64} {
  func.func @_patch_merge_kernel(%arg0: i32, %arg1: memref<8x2x8x8xf32, #tpu.memory_space<vmem>>, %arg2: memref<1x16xf32, #tpu.memory_space<vmem>>, %arg3: memref<1x16xf32, #tpu.memory_space<vmem>>, %arg4: memref<16x8xf32, #tpu.memory_space<vmem>>, %arg5: memref<64x8xf32, #tpu.memory_space<vmem>>) attributes {dimension_semantics = [#tpu.dimension_semantics<parallel>], iteration_bounds = array<i64: 2>, scalar_prefetch = 0 : i64, scratch_operands = 0 : i64, tpu.core_type = #tpu.core_type<tc>, window_params = [{transform_indices = @transform_0, window_bounds = array<i64: 8, 2, 8, 8>}, {pipeline_mode = #tpu.pipeline_mode<synchronous>, transform_indices = @transform_1, window_bounds = array<i64: 1, 16>}, {pipeline_mode = #tpu.pipeline_mode<synchronous>, transform_indices = @transform_2, window_bounds = array<i64: 1, 16>}, {pipeline_mode = #tpu.pipeline_mode<synchronous>, transform_indices = @transform_3, window_bounds = array<i64: 16, 8>}, {transform_indices = @transform_4, window_bounds = array<i64: 64, 8>}]} {
    %c0 = arith.constant 0 : index
    %c0_0 = arith.constant 0 : index
    %c0_1 = arith.constant 0 : index
    %c0_2 = arith.constant 0 : index
    %0 = vector.load %arg1[%c0, %c0_0, %c0_1, %c0_2] : memref<8x2x8x8xf32, #tpu.memory_space<vmem>>, vector<8x1x8x8xf32>
    %1 = vector.shape_cast %0 : vector<8x1x8x8xf32> to vector<8x8x8xf32>
    %c0_3 = arith.constant 0 : index
    %c1 = arith.constant 1 : index
    %c0_4 = arith.constant 0 : index
    %c0_5 = arith.constant 0 : index
    %2 = vector.load %arg1[%c0_3, %c1, %c0_4, %c0_5] : memref<8x2x8x8xf32, #tpu.memory_space<vmem>>, vector<8x1x8x8xf32>
    %3 = vector.shape_cast %2 : vector<8x1x8x8xf32> to vector<8x8x8xf32>
    %4 = vector.extract_strided_slice %1 {offsets = [0, 0, 0], sizes = [8, 8, 4], strides = [1, 1, 1]} : vector<8x8x8xf32> to vector<8x8x4xf32>
    %5 = vector.extract_strided_slice %3 {offsets = [0, 0, 0], sizes = [8, 8, 4], strides = [1, 1, 1]} : vector<8x8x8xf32> to vector<8x8x4xf32>
    %6 = vector.extract_strided_slice %1 {offsets = [0, 0, 4], sizes = [8, 8, 4], strides = [1, 1, 1]} : vector<8x8x8xf32> to vector<8x8x4xf32>
    %7 = vector.extract_strided_slice %3 {offsets = [0, 0, 4], sizes = [8, 8, 4], strides = [1, 1, 1]} : vector<8x8x8xf32> to vector<8x8x4xf32>
    %8 = tpu.concatenate %4, %5, %6, %7 in 2 : vector<8x8x4xf32>, vector<8x8x4xf32>, vector<8x8x4xf32>, vector<8x8x4xf32> -> vector<8x8x16xf32>
    %9 = vector.shape_cast %8 : vector<8x8x16xf32> to vector<64x16xf32>
    %cst = arith.constant dense<0.000000e+00> : vector<64xf32>
    %10 = vector.multi_reduction <add>, %9, %cst [1] : vector<64x16xf32> to vector<64xf32>
    %11 = vector.shape_cast %10 : vector<64xf32> to vector<64x1xf32>
    %12 = arith.mulf %9, %9 : vector<64x16xf32>
    %cst_6 = arith.constant dense<0.000000e+00> : vector<64xf32>
    %13 = vector.multi_reduction <add>, %12, %cst_6 [1] : vector<64x16xf32> to vector<64xf32>
    %14 = vector.shape_cast %13 : vector<64xf32> to vector<64x1xf32>
    %cst_7 = arith.constant 6.250000e-02 : f32
    %15 = vector.broadcast %cst_7 : f32 to vector<64x1xf32>
    %16 = arith.mulf %11, %15 : vector<64x1xf32>
    %cst_8 = arith.constant 6.250000e-02 : f32
    %17 = vector.broadcast %cst_8 : f32 to vector<64x1xf32>
    %18 = arith.mulf %14, %17 : vector<64x1xf32>
    %19 = arith.mulf %16, %16 : vector<64x1xf32>
    %20 = arith.subf %18, %19 : vector<64x1xf32>
    %cst_9 = arith.constant 0.000000e+00 : f32
    %21 = vector.broadcast %cst_9 : f32 to vector<64x1xf32>
    %22 = arith.maximumf %20, %21 : vector<64x1xf32>
    %cst_10 = arith.constant 9.99999974E-6 : f32
    %23 = vector.broadcast %cst_10 : f32 to vector<64x1xf32>
    %24 = arith.addf %22, %23 : vector<64x1xf32>
    %25 = math.rsqrt %24 : vector<64x1xf32>
    %c0_11 = arith.constant 0 : index
    %c0_12 = arith.constant 0 : index
    %26 = vector.load %arg2[%c0_11, %c0_12] : memref<1x16xf32, #tpu.memory_space<vmem>>, vector<1x16xf32>
    %c0_13 = arith.constant 0 : index
    %c0_14 = arith.constant 0 : index
    %27 = vector.load %arg3[%c0_13, %c0_14] : memref<1x16xf32, #tpu.memory_space<vmem>>, vector<1x16xf32>
    %28 = vector.broadcast %16 : vector<64x1xf32> to vector<64x16xf32>
    %29 = arith.subf %9, %28 : vector<64x16xf32>
    %30 = vector.broadcast %25 : vector<64x1xf32> to vector<64x16xf32>
    %31 = arith.mulf %29, %30 : vector<64x16xf32>
    %32 = vector.broadcast %26 : vector<1x16xf32> to vector<64x16xf32>
    %33 = arith.mulf %31, %32 : vector<64x16xf32>
    %34 = vector.broadcast %27 : vector<1x16xf32> to vector<64x16xf32>
    %35 = arith.addf %33, %34 : vector<64x16xf32>
    %c0_15 = arith.constant 0 : index
    %c0_16 = arith.constant 0 : index
    %36 = vector.load %arg4[%c0_15, %c0_16] : memref<16x8xf32, #tpu.memory_space<vmem>>, vector<16x8xf32>
    %cst_17 = arith.constant dense<0.000000e+00> : vector<64x8xf32>
    %37 = tpu.matmul %35, %36, %cst_17 {dimension_numbers = #tpu.dot_dimension_numbers<[1], [0], [0], [1], [0, 0, 1, 1], [], []>} : vector<64x16xf32>, vector<16x8xf32>, vector<64x8xf32> -> vector<64x8xf32>
    %c0_18 = arith.constant 0 : index
    %c0_19 = arith.constant 0 : index
    %38 = vector.load %arg5[%c0_18, %c0_19] : memref<64x8xf32, #tpu.memory_space<vmem>>, vector<64x8xf32>
    tpu.vector_store %arg5[%c0_18, %c0_19], %37 {strides = array<i32>} : memref<64x8xf32, #tpu.memory_space<vmem>>, vector<64x8xf32>,
    return
  }
  func.func @transform_0(%arg0: i32) -> (i32, i32, i32, i32) {
    %c0_i32 = arith.constant 0 : i32
    %c0_i32_0 = arith.constant 0 : i32
    %c0_i32_1 = arith.constant 0 : i32
    %c0_i32_2 = arith.constant 0 : i32
    return %arg0, %c0_i32, %c0_i32_0, %c0_i32_1 : i32, i32, i32, i32
  }
  func.func @transform_1(%arg0: i32) -> (i32, i32) {
    %c0_i32 = arith.constant 0 : i32
    %c0_i32_0 = arith.constant 0 : i32
    %c0_i32_1 = arith.constant 0 : i32
    return %c0_i32, %c0_i32_0 : i32, i32
  }
  func.func @transform_2(%arg0: i32) -> (i32, i32) {
    %c0_i32 = arith.constant 0 : i32
    %c0_i32_0 = arith.constant 0 : i32
    %c0_i32_1 = arith.constant 0 : i32
    return %c0_i32, %c0_i32_0 : i32, i32
  }
  func.func @transform_3(%arg0: i32) -> (i32, i32) {
    %c0_i32 = arith.constant 0 : i32
    %c0_i32_0 = arith.constant 0 : i32
    %c0_i32_1 = arith.constant 0 : i32
    return %c0_i32, %c0_i32_0 : i32, i32
  }
  func.func @transform_4(%arg0: i32) -> (i32, i32) {
    %c0_i32 = arith.constant 0 : i32
    %c0_i32_0 = arith.constant 0 : i32
    return %arg0, %c0_i32 : i32, i32
  }
}

</mosaic_0001>

<bundles_post_ra>
// kernel: tpu_custom_call.1
= control target key start
LH: loop header
LB: loop body
LE: loop exit
PB: predicated region body
PF: predicated region fallthrough
CT: control target
= control target key end

     0   :  { %s814_s15 = smov 0   ;;  %s1033_s0 = inlined_call_operand.vmem [shape: f32[16,2,8,8], index: 0, kind: input, shape index: {}]   ;;  %s1034_s1 = inlined_call_operand.vmem [shape: f32[1,16], index: 1, kind: input, shape index: {}]   ;;  %s1035_s2 = inlined_call_operand.vmem [shape: f32[1,16], index: 2, kind: input, shape index: {}]   ;;  %s1036_s3 = inlined_call_operand.vmem [shape: f32[16,8], index: 3, kind: input, shape index: {}]   ;;  %s1037_s4 = inlined_call_operand.vmem [shape: f32[128,8], index: 4, kind: output, shape index: {}]  }
   0x1 LB: > { %s690_s16 = sadd.s32 4294967295, %s785_s15   ;;  %p694_p0 = scmp.ge.s32.totalorder %s785_s15, 1  ;;  %s785_s15 = sphi %s814_s15, %s14_s15  }
   0x2   : > { %p164_p1 = scmp.lt.s32.totalorder %s785_s15, 3 }
   0x4   : > { %p165_p2 = pnand %p694_p0, %p164_p1 }
   0x5   : > { %s695_s17 = sshll.u32 (!%p165_p2), %s690_s16, 3  ;;  %s787_s22 = smov (!%p165_p2), 4   ;;  %vm309_vm0 = vcmask (!%p165_p2), 31744   ;;  %vm318_vm1 = vcmask (!%p165_p2), 64512   ;;  %vm327_vm2 = vcmask (!%p165_p2), 97280   ;;  %vm336_vm3 = vcmask (!%p165_p2), 130048  }
   0x6   : > { %168 = sbr.rel (%p165_p2) target bundleno = 576 (0x240), region = 36  ;;  %p192_p3 = scmp.lt.s32.totalorder (!%p165_p2), %s695_s17, 15 }
   0x7   : > { %s788_s23 = smov (!%p165_p2), 8  }
   0xd   : > { %s1039_s17 = smov (!%p192_p3, %s695_s17), 15 }
   0xe   : > { %s720_s18 = sshll.u32 %s1039_s17, 4  ;;  %s699_s6 = sshll.u32 %s1039_s17, 3 }
   0xf   : > { %s828_s21 = scalar_lea.vmem %s1033_s0, %s720_s18  ;;  %s202_s9 = scalar_lea.vmem %s1037_s4, %s699_s6 }
  0x10   : > { %v701_v0 = vld [vmem:[%s828_s21 + $0x18] sm:$0xff]  ;;  %v700_v1 = vld [vmem:[%s828_s21 + $0x8] sm:$0xff]  ;;  %v208_v4 = vld [vmem:[%s828_s21 + $0x40] sm:$0xff] }
  0x11   : > { %231 = vrot.lane.b32.xlu1 %v701_v0, %s787_s22  ;;  %229 = vrot.lane.b32.xlu0 %v700_v1, %s787_s22  ;;  %v705_v2 = vld [vmem:[%s828_s21 + $0x58] sm:$0xff]  ;;  %v704_v3 = vld [vmem:[%s828_s21 + $0x48] sm:$0xff] }
  0x12   : > { %v204_v5 = vld [vmem:[%s828_s21] sm:$0xff]  ;;  %v209_v6 = vld [vmem:[%s828_s21 + $0x50] sm:$0xff]  ;;  %v706_v8 = vld [vmem:[%s828_s21 + $0x68] sm:$0xff] }
  0x13   : > { %v205_v7 = vld [vmem:[%s828_s21 + $0x10] sm:$0xff]  ;;  %v702_v9 = vld [vmem:[%s828_s21 + $0x28] sm:$0xff]  ;;  %v707_v10 = vld [vmem:[%s828_s21 + $0x78] sm:$0xff] }
  0x14   : > { %v703_v11 = vld [vmem:[%s828_s21 + $0x38] sm:$0xff]  ;;  %v210_v12 = vld [vmem:[%s828_s21 + $0x60] sm:$0xff]  ;;  %v859_v14 = vld [vmem:[%s828_s21 + $0x70] sm:$0xff] }
  0x15   : > { %239 = vrot.lane.b32.xlu1 %v705_v2, %s787_s22  ;;  %237 = vrot.lane.b32.xlu0 %v704_v3, %s787_s22  ;;  %v206_v13 = vld [vmem:[%s828_s21 + $0x20] sm:$0xff]  ;;  %v862_v15 = vld [vmem:[%s828_s21 + $0x30] sm:$0xff] }
  0x19   : > { %269 = vrot.lane.b32.xlu1 %v208_v4, %s787_s22  ;;  %261 = vrot.lane.b32.xlu0 %v204_v5, %s787_s22 }
  0x1d   : > { %271 = vrot.lane.b32.xlu1 %v209_v6, %s787_s22  ;;  %263 = vrot.lane.b32.xlu0 %v205_v7, %s787_s22 }
  0x21   : > { %293 = vrot.lane.b32.xlu1 %v704_v3, %s788_s23  ;;  %285 = vrot.lane.b32.xlu0 %v700_v1, %s788_s23 }
  0x25   : > { %295 = vrot.lane.b32.xlu1 %v705_v2, %s788_s23  ;;  %287 = vrot.lane.b32.xlu0 %v701_v0, %s788_s23 }
  0x29   : > { %241 = vrot.lane.b32.xlu1 %v706_v8, %s787_s22  ;;  %233 = vrot.lane.b32.xlu0 %v702_v9, %s787_s22 }
  0x2d   : > { %243 = vrot.lane.b32.xlu1 %v707_v10, %s787_s22  ;;  %235 = vrot.lane.b32.xlu0 %v703_v11, %s787_s22 }
  0x31   : > { %273 = vrot.lane.b32.xlu1 %v210_v12, %s787_s22  ;;  %265 = vrot.lane.b32.xlu0 %v206_v13, %s787_s22 }
  0x35   : > { %275 = vrot.lane.b32.xlu1 %v859_v14, %s787_s22  ;;  %267 = vrot.lane.b32.xlu0 %v862_v15, %s787_s22 }
  0x39   : > { %297 = vrot.lane.b32.xlu1 %v706_v8, %s788_s23  ;;  %289 = vrot.lane.b32.xlu0 %v702_v9, %s788_s23 }
  0x3d   : > { %299 = vrot.lane.b32.xlu1 %v707_v10, %s788_s23  ;;  %291 = vrot.lane.b32.xlu0 %v703_v11, %s788_s23 }
  0x83   : > { %v232_v16 = vpop.permute.xlu1 %231  ;;  %v230_v17 = vpop.permute.xlu0 %229 }
  0x84   : > { %v310_v24 = vsel %vm309_vm0, %v204_v5, %v230_v17  ;;  %v311_v34 = vsel %vm309_vm0, %v205_v7, %v232_v16 }
  0x87   : > { %v240_v18 = vpop.permute.xlu1 %239  ;;  %v238_v19 = vpop.permute.xlu0 %237 }
  0x88   : > { %v314_v25 = vsel %vm309_vm0, %v208_v4, %v238_v19  ;;  %v315_v38 = vsel %vm309_vm0, %v209_v6, %v240_v18 }
  0x8b   : > { %v270_v20 = vpop.permute.xlu1 %269  ;;  %v262_v21 = vpop.permute.xlu0 %261 }
  0x8c   : > { %v323_v26 = vsel %vm318_vm1, %v314_v25, %v270_v20  ;;  %v319_v27 = vsel %vm318_vm1, %v310_v24, %v262_v21  ;;  %v495_v24 = vld [vmem:[%s1036_s3] sm:$0xff]  ;;  %v496_v25 = vld [vmem:[%s1036_s3 + $0x8] sm:$0xff] }
  0x8f   : > { %v272_v22 = vpop.permute.xlu1 %271  ;;  %v264_v23 = vpop.permute.xlu0 %263 }
  0x90   : > { %v320_v35 = vsel %vm318_vm1, %v311_v34, %v264_v23  ;;  %v324_v40 = vsel %vm318_vm1, %v315_v38, %v272_v22 }
  0x93   : > { %v294_v28 = vpop.permute.xlu1 %293  ;;  %v286_v29 = vpop.permute.xlu0 %285 }
  0x94   : > { %v873_v30 = vsel %vm327_vm2, %v323_v26, %v294_v28  ;;  %v876_v31 = vsel %vm327_vm2, %v319_v27, %v286_v29  ;;  %v747_v26 = vpack.c.bf16 %v496_v25, %v495_v24 }
  0x95   : > { %v349_v32 = vsel %vm336_vm3, %v873_v30, 0.0  ;;  %v337_v33 = vsel %vm336_vm3, %v876_v31, 0.0  ;;  %v361_v8 = vmul.f32 %v876_v31, %v876_v31  ;;  %v365_v9 = vmul.f32 %v873_v30, %v873_v30 }
  0x96   : > { %350 = vadd.xlane.f32.xlu1 %v349_v32  ;;  %338 = vadd.xlane.f32.xlu0 %v337_v33 }
  0x97   : > { %v296_v36 = vpop.permute.xlu1 %295  ;;  %v288_v37 = vpop.permute.xlu0 %287  ;;  %v369_v10 = vsel %vm336_vm3, %v361_v8, 0.0  ;;  %v381_v11 = vsel %vm336_vm3, %v365_v9, 0.0  ;;  %748 = vmatprep.subr.bf16.mxu0 %v747_v26  ;;  %751 = vmatprep.subr.bf16.mxu1 %v747_v26 }
  0x98   : > { %v886_v39 = vsel %vm327_vm2, %v320_v35, %v288_v37  ;;  %v892_v42 = vsel %vm327_vm2, %v324_v40, %v296_v36  ;;  %750 = vmatpush3.bf16.msra.mxu0 %v747_v26  ;;  %752 = vmatpush3.bf16.msra.mxu1 %v747_v26 }
  0x99   : > { %v340_v41 = vsel %vm336_vm3, %v886_v39, 0.0  ;;  %v352_v45 = vsel %vm336_vm3, %v892_v42, 0.0 }
  0x9a   : > { %341 = vadd.xlane.f32.xlu0 %v340_v41 }
  0x9b   : > { %v242_v43 = vpop.permute.xlu1 %241  ;;  %v234_v44 = vpop.permute.xlu0 %233 }
  0x9c   : > { %v316_v52 = vsel %vm309_vm0, %v210_v12, %v242_v43  ;;  %v312_v53 = vsel %vm309_vm0, %v206_v13, %v234_v44  ;;  %v362_v12 = vmul.f32 %v886_v39, %v886_v39  ;;  %v366_v13 = vmul.f32 %v892_v42, %v892_v42 }
  0x9e   : > { %353 = vadd.xlane.f32.xlu0 %v352_v45 }
  0x9f   : > { %v244_v46 = vpop.permute.xlu1 %243  ;;  %v236_v47 = vpop.permute.xlu0 %235 }
  0xa0   : > { %v317_v62 = vsel %vm309_vm0, %v859_v14, %v244_v46  ;;  %v313_v63 = vsel %vm309_vm0, %v862_v15, %v236_v47  ;;  %v372_v14 = vsel %vm336_vm3, %v362_v12, 0.0  ;;  %v384_v15 = vsel %vm336_vm3, %v366_v13, 0.0 }
  0xa3   : > { %v274_v48 = vpop.permute.xlu1 %273  ;;  %v266_v49 = vpop.permute.xlu0 %265 }
  0xa4   : > { %v325_v54 = vsel %vm318_vm1, %v316_v52, %v274_v48  ;;  %v321_v55 = vsel %vm318_vm1, %v312_v53, %v266_v49 }
  0xa7   : > { %v276_v50 = vpop.permute.xlu1 %275  ;;  %v268_v51 = vpop.permute.xlu0 %267 }
  0xa8   : > { %v326_v0 = vsel %vm318_vm1, %v317_v62, %v276_v50  ;;  %v322_v1 = vsel %vm318_vm1, %v313_v63, %v268_v51 }
  0xab   : > { %v298_v56 = vpop.permute.xlu1 %297  ;;  %v290_v57 = vpop.permute.xlu0 %289 }
  0xac   : > { %v901_v58 = vsel %vm327_vm2, %v325_v54, %v298_v56  ;;  %v904_v59 = vsel %vm327_vm2, %v321_v55, %v290_v57 }
  0xad   : > { %v343_v60 = vsel %vm336_vm3, %v904_v59, 0.0  ;;  %v355_v61 = vsel %vm336_vm3, %v901_v58, 0.0  ;;  %v363_v16 = vmul.f32 %v904_v59, %v904_v59  ;;  %v367_v17 = vmul.f32 %v901_v58, %v901_v58 }
  0xae   : > { %344 = vadd.xlane.f32.xlu1 %v343_v60  ;;  %356 = vadd.xlane.f32.xlu0 %v355_v61 }
  0xaf   : > { %v300_v2 = vpop.permute.xlu1 %299  ;;  %v292_v3 = vpop.permute.xlu0 %291  ;;  %v375_v18 = vsel %vm336_vm3, %v363_v16, 0.0  ;;  %v387_v19 = vsel %vm336_vm3, %v367_v17, 0.0 }
  0xb0   : > { %v917_v4 = vsel %vm327_vm2, %v326_v0, %v300_v2  ;;  %v920_v5 = vsel %vm327_vm2, %v322_v1, %v292_v3 }
  0xb1   : > { %v346_v6 = vsel %vm336_vm3, %v920_v5, 0.0  ;;  %v358_v7 = vsel %vm336_vm3, %v917_v4, 0.0  ;;  %v364_v20 = vmul.f32 %v920_v5, %v920_v5  ;;  %v368_v21 = vmul.f32 %v917_v4, %v917_v4 }
  0xb2   : > { %347 = vadd.xlane.f32.xlu1 %v346_v6  ;;  %359 = vadd.xlane.f32.xlu0 %v358_v7 }
  0xb3   : > { %v378_v22 = vsel %vm336_vm3, %v364_v20, 0.0  ;;  %v390_v23 = vsel %vm336_vm3, %v368_v21, 0.0 }
  0xb6   : > { %370 = vadd.xlane.f32.xlu1 %v369_v10  ;;  %382 = vadd.xlane.f32.xlu0 %v381_v11 }
  0xba   : > { %373 = vadd.xlane.f32.xlu1 %v372_v14  ;;  %385 = vadd.xlane.f32.xlu0 %v384_v15 }
  0xbe   : > { %376 = vadd.xlane.f32.xlu1 %v375_v18  ;;  %388 = vadd.xlane.f32.xlu0 %v387_v19 }
  0xc2   : > { %379 = vadd.xlane.f32.xlu1 %v378_v22  ;;  %391 = vadd.xlane.f32.xlu0 %v390_v23 }
 0x123   : > { %v339_v27 = vpop.xlane.xlu0 %338  ;;  %v351_v29 = vpop.xlane.xlu1 %350 }
 0x124   : > { %v956_v37 = vmul.f32 0.0625, %v351_v29  ;;  %v958_v38 = vmul.f32 0.0625, %v339_v27 }
 0x126   : > { %v413_v45 = vmul.f32 %v956_v37, %v956_v37  ;;  %v409_v46 = vmul.f32 %v958_v38, %v958_v38 }
 0x127   : > { %v342_v28 = vpop.xlane.xlu0 %341 }
 0x128   : > { %v960_v40 = vmul.f32 0.0625, %v342_v28 }
 0x12a   : > { %v410_v51 = vmul.f32 %v960_v40, %v960_v40 }
 0x12b   : > { %v354_v32 = vpop.xlane.xlu0 %353 }
 0x12c   : > { %v962_v41 = vmul.f32 0.0625, %v354_v32 }
 0x12e   : > { %v414_v52 = vmul.f32 %v962_v41, %v962_v41 }
 0x13b   : > { %v345_v33 = vpop.xlane.xlu1 %344  ;;  %v357_v34 = vpop.xlane.xlu0 %356 }
 0x13c   : > { %v972_v53 = vmul.f32 0.0625, %v345_v33  ;;  %v974_v62 = vmul.f32 0.0625, %v357_v34 }
 0x13e   : > { %v411_v3 = vmul.f32 %v972_v53, %v972_v53  ;;  %v415_v13 = vmul.f32 %v974_v62, %v974_v62 }
 0x13f   : > { %v348_v35 = vpop.xlane.xlu1 %347  ;;  %v360_v36 = vpop.xlane.xlu0 %359 }
 0x140   : > { %v978_v6 = vmul.f32 0.0625, %v348_v35  ;;  %v980_v7 = vmul.f32 0.0625, %v360_v36  ;;  %v451_v35 = vsub.f32 %v876_v31, %v958_v38  ;;  %v452_v31 = vsub.f32 %v886_v39, %v960_v40 }
 0x141   : > { %v457_v39 = vsub.f32 %v901_v58, %v974_v62 }
 0x142   : > { %v412_v18 = vmul.f32 %v978_v6, %v978_v6  ;;  %v416_v19 = vmul.f32 %v980_v7, %v980_v7 }
 0x143   : > { %v371_v43 = vpop.xlane.xlu1 %370  ;;  %v383_v44 = vpop.xlane.xlu0 %382 }
 0x144   : > { %v401_v47 = vmul.f32 0.0625, %v371_v43  ;;  %v405_v48 = vmul.f32 0.0625, %v383_v44  ;;  %v455_v43 = vsub.f32 %v873_v30, %v956_v37  ;;  %v456_v37 = vsub.f32 %v892_v42, %v962_v41 }
 0x146   : > { %v417_v49 = vsub.f32 %v401_v47, %v409_v46  ;;  %v421_v50 = vsub.f32 %v405_v48, %v413_v45  ;;  %v708_v46 = vld [vmem:[%s1034_s1] ss:$0 sm:$0xff] }
 0x147   : > { %v374_v54 = vpop.xlane.xlu1 %373  ;;  %v386_v55 = vpop.xlane.xlu0 %385 }
 0x148   : > { %v425_v56 = vmax.f32 %v417_v49, 0.0  ;;  %v429_v57 = vmax.f32 %v421_v50, 0.0  ;;  %v402_v60 = vmul.f32 0.0625, %v374_v54  ;;  %v406_v61 = vmul.f32 0.0625, %v386_v55  ;;  %v709_v49 = vld [vmem:[%s1035_s2] ss:$0 sm:$0xff] }
 0x14a   : > { %v433_v63 = vadd.f32 1e-05, %v425_v56  ;;  %v437_v0 = vadd.f32 1e-05, %v429_v57  ;;  %v418_v1 = vsub.f32 %v402_v60, %v410_v51  ;;  %v422_v2 = vsub.f32 %v406_v61, %v414_v52 }
 0x14b   : > { %v377_v8 = vpop.xlane.xlu1 %376  ;;  %v389_v9 = vpop.xlane.xlu0 %388  ;;  %v453_v60 = vsub.f32 %v904_v59, %v972_v53 }
 0x14c   : > { %763 = vrsqrt.f32 %v433_v63  ;;  %v426_v10 = vmax.f32 %v418_v1, 0.0  ;;  %v430_v11 = vmax.f32 %v422_v2, 0.0  ;;  %v403_v12 = vmul.f32 0.0625, %v377_v8 }
 0x14d   : > { %765 = vrsqrt.f32 %v437_v0  ;;  %v407_v14 = vmul.f32 0.0625, %v389_v9  ;;  %v458_v8 = vsub.f32 %v917_v4, %v980_v7 }
 0x14e   : > { %v434_v15 = vadd.f32 1e-05, %v426_v10  ;;  %v438_v16 = vadd.f32 1e-05, %v430_v11  ;;  %v419_v17 = vsub.f32 %v403_v12, %v411_v3  ;;  %v454_v3 = vsub.f32 %v920_v5, %v978_v6 }
 0x14f   : > { %v423_v20 = vsub.f32 %v407_v14, %v415_v13  ;;  %v380_v21 = vpop.xlane.xlu1 %379  ;;  %v392_v22 = vpop.xlane.xlu0 %391 }
 0x150   : > { %767 = vrsqrt.f32 %v434_v15  ;;  %v427_v23 = vmax.f32 %v419_v17, 0.0  ;;  %v404_v24 = vmul.f32 0.0625, %v380_v21  ;;  %v408_v25 = vmul.f32 0.0625, %v392_v22 }
 0x151   : > { %769 = vrsqrt.f32 %v438_v16  ;;  %v431_v26 = vmax.f32 %v423_v20, 0.0 }
 0x152   : > { %v435_v27 = vadd.f32 1e-05, %v427_v23  ;;  %v420_v28 = vsub.f32 %v404_v24, %v412_v18  ;;  %v424_v29 = vsub.f32 %v408_v25, %v416_v19 }
 0x153   : > { %v439_v32 = vadd.f32 1e-05, %v431_v26 }
 0x154   : > { %771 = vrsqrt.f32 %v435_v27  ;;  %v428_v33 = vmax.f32 %v420_v28, 0.0  ;;  %v432_v34 = vmax.f32 %v424_v29, 0.0 }
 0x155   : > { %773 = vrsqrt.f32 %v439_v32 }
 0x156   : > { %v764_v36 = vpop.eup %763  ;;  %v436_v44 = vadd.f32 1e-05, %v428_v33  ;;  %v440_v45 = vadd.f32 1e-05, %v432_v34 }
 0x157   : > { %v766_v47 = vpop.eup %765  ;;  %v459_v48 = vmul.f32 %v764_v36, %v451_v35 }
 0x158   : > { %775 = vrsqrt.f32 %v436_v44  ;;  %v463_v50 = vmul.f32 %v766_v47, %v455_v43 }
 0x159   : > { %777 = vrsqrt.f32 %v440_v45  ;;  %v473_v38 = vmul.f32 %v708_v46, %v459_v48 }
 0x15a   : > { %v768_v30 = vpop.eup %767  ;;  %v477_v51 = vmul.f32 %v708_v46, %v463_v50 }
 0x15b   : > { %v770_v52 = vpop.eup %769  ;;  %v487_v54 = vadd.f32 %v709_v49, %v473_v38  ;;  %v460_v55 = vmul.f32 %v768_v30, %v452_v31 }
 0x15c   : > { %v491_v56 = vadd.f32 %v709_v49, %v477_v51  ;;  %v464_v57 = vmul.f32 %v770_v52, %v456_v37 }
 0x15d   : > { %735 = vmatprep.mubr.msk.f32.mxu0 %vm336_vm3, %v487_v54  ;;  %v474_v61 = vmul.f32 %v708_v46, %v460_v55 }
 0x15e   : > { %v772_v63 = vpop.eup %771  ;;  %741 = vmatprep.mubr.msk.f32.mxu1 %vm336_vm3, %v491_v56  ;;  %v478_v40 = vmul.f32 %v708_v46, %v464_v57 }
 0x15f   : > { %v774_v42 = vpop.eup %773  ;;  %v488_v41 = vadd.f32 %v709_v49, %v474_v61  ;;  %v461_v0 = vmul.f32 %v772_v63, %v453_v60 }
 0x160   : > { %v492_v1 = vadd.f32 %v709_v49, %v478_v40  ;;  %v465_v2 = vmul.f32 %v774_v42, %v457_v39 }
 0x161   : > { %736 = vmatmul.mubr.msk.f32.vlgmr.msra.gmra.mrb[0].mxu0 %vm336_vm3, %v488_v41  ;;  %v475_v59 = vmul.f32 %v708_v46, %v461_v0 }
 0x162   : > { %v776_v53 = vpop.eup %775  ;;  %742 = vmatmul.mubr.msk.f32.vlgmr.msra.gmra.mrb[0].mxu1 %vm336_vm3, %v492_v1  ;;  %v479_v58 = vmul.f32 %v708_v46, %v465_v2 }
 0x163   : > { %v778_v62 = vpop.eup %777  ;;  %v489_v9 = vadd.f32 %v709_v49, %v475_v59  ;;  %v462_v10 = vmul.f32 %v776_v53, %v454_v3 }
 0x164   : > { %v493_v11 = vadd.f32 %v709_v49, %v479_v58  ;;  %v466_v12 = vmul.f32 %v778_v62, %v458_v8 }
 0x165   : > { %738 = vmatprep.mubr.msk.f32.mxu0 %vm336_vm3, %v489_v9  ;;  %v476_v13 = vmul.f32 %v708_v46, %v462_v10 }
 0x166   : > { %744 = vmatprep.mubr.msk.f32.mxu1 %vm336_vm3, %v493_v11  ;;  %v480_v5 = vmul.f32 %v708_v46, %v466_v12 }
 0x167   : > { %v490_v6 = vadd.f32 %v709_v49, %v476_v13 }
 0x168   : > { %v494_v14 = vadd.f32 %v709_v49, %v480_v5 }
 0x169   : > { %739 = vmatmul.mubr.msk.f32.gmra.mrb[2].mxu0 %vm336_vm3, %v490_v6 }
 0x16a   : > { %745 = vmatmul.mubr.msk.f32.gmra.mrb[2].mxu1 %vm336_vm3, %v494_v14 }
 0x234   : > { %v737_v4 = vpop.f32.mrb[0].mxu0 }
 0x235   : > { %627 = vst.msk [vmem:[%s202_s9 + $0x8] sm:$0xff] %vm318_vm1, %v737_v4  ;;  %v743_v7 = vpop.f32.mrb[0].mxu1  ;;  %v587_v15 = vpop.f32.mrb[1].mxu0 }
 0x236   : > { %631 = vst.msk [vmem:[%s202_s9 + $0x28] sm:$0xff] %vm318_vm1, %v743_v7  ;;  %626 = vst.msk [vmem:[%s202_s9] sm:$0xff] %vm318_vm1, %v587_v15  ;;  %v607_v16 = vpop.f32.mrb[1].mxu1 }
 0x237   : > { %630 = vst.msk [vmem:[%s202_s9 + $0x20] sm:$0xff] %vm318_vm1, %v607_v16 }
 0x23c   : > { %v740_v17 = vpop.f32.mrb[2].mxu0 }
 0x23d   : > { %629 = vst.msk [vmem:[%s202_s9 + $0x18] sm:$0xff] %vm318_vm1, %v740_v17  ;;  %v746_v18 = vpop.f32.mrb[2].mxu1  ;;  %v597_v19 = vpop.f32.mrb[3].mxu0 }
 0x23e   : > { %633 = vst.msk [vmem:[%s202_s9 + $0x38] sm:$0xff] %vm318_vm1, %v746_v18  ;;  %628 = vst.msk [vmem:[%s202_s9 + $0x10] sm:$0xff] %vm318_vm1, %v597_v19  ;;  %v617_v20 = vpop.f32.mrb[3].mxu1 }
 0x23f   : > { %632 = vst.msk [vmem:[%s202_s9 + $0x30] sm:$0xff] %vm318_vm1, %v617_v20 }
 0x240 PF: > { %s14_s15 = sadd.s32 1, %s785_s15  }
 0x241   : > { %p11_p4 = scmp.ge.s32.totalorder %s14_s15, 4  }
 0x243   :  { %13 = sbr.rel (!%p11_p4) target bundleno = 1 (0x1), region = 67 }

</bundles_post_ra>
